<compile_context>
chip_gen: v7x
topology: tpu7x:2x2x1
jax: 0.10.0
libtpu: 0.0.40
codegen_flags: <defaults>
</compile_context>

<pallas_src>
import functools

import jax
import jax.numpy as jnp
from jax.experimental import pallas as pl
from jax.experimental.pallas import tpu as pltpu


def _round_up(x, m):
    return ((x + m - 1) // m) * m


def dnn_kernel(x_ref, w1_ref, b1_ref, w2_ref, b2_ref, w3_ref, b3_ref, out_ref):
    # Each ref is loaded exactly once; three MXU matmuls, two ReLUs, done.
    x = x_ref[...]

    p = jnp.dot(x, w1_ref[...], preferred_element_type=jnp.float32) + b1_ref[...]
    p = jnp.maximum(p, 0.0)                       # [relu(pre12) | relu(pre21)]

    q = jnp.dot(p.astype(w2_ref.dtype), w2_ref[...],
                preferred_element_type=jnp.float32) + b2_ref[...]
    q = jnp.maximum(q, 0.0)                       # [h2_12 | h2_21]

    o = jnp.dot(q.astype(w3_ref.dtype), w3_ref[...],
                preferred_element_type=jnp.float32) + b3_ref[...]
    out_ref[...] = o.astype(out_ref.dtype)        # 0.5 avg folded into W3c


@functools.partial(jax.jit, static_argnames=("batch_tile", "compute_dtype"))
def dnn_forward(x1, x2, params, *, batch_tile=512, compute_dtype=jnp.bfloat16):
    """Pallas implementation of DNN.forward (DNN_layers1=2, DNN_layers2=1).

    Weights are stored pre-transposed as (in, out) relative to nn.Linear.
    Supports in_dim1 != in_dim2.
    """
    w1, b1, w2, b2, w3, b3 = params
    B, d1 = x1.shape
    B2, d2 = x2.shape
    assert B == B2
    D = d1 + d2
    assert w1.shape[0] == D
    h0 = w1.shape[1]
    h1 = w2.shape[1]
    c = w3.shape[1]
    cd = jnp.dtype(compute_dtype)

    # ---- batch tile: multiple of 16 (bf16 sublane packing), <= batch_tile,
    #      and try to leave >= 2 parallel grid steps for megacore chips.
    bt = min(int(batch_tile), _round_up(max(B // 2, 1), 16))
    bt = _round_up(max(bt, 16), 16)
    B_pad = _round_up(B, bt)
    grid = (B_pad // bt,)

    # ---- one-time wrapper-side operand preparation -------------------------
    # Activations: single lane-concatenated, batch-padded stream.
    x_cat = jnp.concatenate([x1, x2], axis=1).astype(cd)          # (B, D)
    x_cat = jnp.zeros((B_pad, D), cd).at[:B].set(x_cat)

    # Layer-1 combined weight:  [x1|x2] @ W1c = [cat(x1,x2)@W1 | cat(x2,x1)@W1]
    w_a = w1[:d1]            # multiplies x1 in cat(x1,x2)
    w_b = w1[d1:]            # multiplies x2 in cat(x1,x2)
    w_c = w1[:d2]            # multiplies x2 in cat(x2,x1)
    w_d = w1[d2:]            # multiplies x1 in cat(x2,x1)
    w1c = jnp.concatenate(
        [jnp.concatenate([w_a, w_d], axis=1),                     # rows for x1
         jnp.concatenate([w_b, w_c], axis=1)], axis=0).astype(cd)  # (D, 2*h0)
    b1c = jnp.concatenate([b1, b1], axis=1).astype(jnp.float32)   # (1, 2*h0)

    # Layer-2 block-diagonal weight: applies W2 to both branches at once.
    z01 = jnp.zeros((h0, h1), w2.dtype)
    w2c = jnp.concatenate(
        [jnp.concatenate([w2, z01], axis=1),
         jnp.concatenate([z01, w2], axis=1)], axis=0).astype(cd)  # (2*h0, 2*h1)
    b2c = jnp.concatenate([b2, b2], axis=1).astype(jnp.float32)   # (1, 2*h1)

    # Final layer: fold the 0.5 average into the stacked weight; pad classes
    # to 128 lanes for an unmasked, lane-dense output store.
    c_pad = _round_up(max(c, 128), 128)
    w3_stack = 0.5 * jnp.concatenate([w3, w3], axis=0)            # (2*h1, c)
    w3c = jnp.zeros((2 * h1, c_pad), cd).at[:, :c].set(w3_stack.astype(cd))
    b3p = jnp.zeros((1, c_pad), jnp.float32).at[:, :c].set(b3.astype(jnp.float32))

    # ---- advisory cost estimate for XLA scheduling around this small kernel
    flops = 2 * int(B_pad) * (D * 2 * h0 + 2 * h0 * 2 * h1 + 2 * h1 * c_pad)
    bytes_accessed = (
        B_pad * D * cd.itemsize                                        # acts in
        + (D * 2 * h0 + 4 * h0 * h1 + 2 * h1 * c_pad) * cd.itemsize    # weights
        + (2 * h0 + 2 * h1 + c_pad) * 4                                # biases
        + B_pad * c_pad * 4                                            # output
    )

    full = lambda i: (0, 0)
    out = pl.pallas_call(
        dnn_kernel,
        out_shape=jax.ShapeDtypeStruct((B_pad, c_pad), jnp.float32),
        grid=grid,
        in_specs=[
            pl.BlockSpec((bt, D), lambda i: (i, 0)),       # activation tile
            pl.BlockSpec((D, 2 * h0), full),               # W1c   (resident)
            pl.BlockSpec((1, 2 * h0), full),               # b1c
            pl.BlockSpec((2 * h0, 2 * h1), full),          # W2c   (resident)
            pl.BlockSpec((1, 2 * h1), full),               # b2c
            pl.BlockSpec((2 * h1, c_pad), full),           # W3c   (lane-padded)
            pl.BlockSpec((1, c_pad), full),                # b3    (lane-padded)
        ],
        out_specs=pl.BlockSpec((bt, c_pad), lambda i: (i, 0)),
        compiler_params=pltpu.CompilerParams(
            dimension_semantics=("parallel",)),
        cost_estimate=pl.CostEstimate(
            flops=flops, transcendentals=0, bytes_accessed=int(bytes_accessed)),
    )(x_cat, w1c, b1c, w2c, b2c, w3c, b3p)

    return out[:B, :c]


def init_params(key, in_dim1, in_dim2, hidden_dims1, class_num):
    """Deterministic parameter init.  Weights stored (in, out), i.e. already
    transposed relative to PyTorch nn.Linear."""
    in_dim = in_dim1 + in_dim2
    k1, k2, k3, k4, k5, k6 = jax.random.split(key, 6)
    w1 = 0.1 * jax.random.normal(k1, (in_dim, hidden_dims1[0]), jnp.float32)
    b1 = 0.1 * jax.random.normal(k2, (1, hidden_dims1[0]), jnp.float32)
    w2 = 0.1 * jax.random.normal(k3, (hidden_dims1[0], hidden_dims1[1]), jnp.float32)
    b2 = 0.1 * jax.random.normal(k4, (1, hidden_dims1[1]), jnp.float32)
    w3 = 0.1 * jax.random.normal(k5, (hidden_dims1[1], class_num), jnp.float32)
    b3 = 0.1 * jax.random.normal(k6, (1, class_num), jnp.float32)
    return (w1, b1, w2, b2, w3, b3)


def dnn_forward_ref(x1, x2, params, compute_dtype=jnp.float32):
    """Pure-JAX reference (casts operands like the kernel, accumulates in f32)."""
    w1, b1, w2, b2, w3, b3 = params
    cd = jnp.dtype(compute_dtype)
    x12 = jnp.concatenate([x1, x2], axis=1).astype(cd)
    x21 = jnp.concatenate([x2, x1], axis=1).astype(cd)

    def dnn1(x):
        h = jnp.maximum(
            jnp.dot(x, w1.astype(cd), preferred_element_type=jnp.float32) + b1, 0.0)
        h = jnp.maximum(
            jnp.dot(h.astype(cd), w2.astype(cd),
                    preferred_element_type=jnp.float32) + b2, 0.0)
        return h

    h = (dnn1(x12) + dnn1(x21)) * 0.5
    return jnp.dot(h.astype(cd), w3.astype(cd),
                   preferred_element_type=jnp.float32) + b3


if __name__ == "__main__":
    # Small shapes consistent with the module's forward:
    #   x1: (B, in_dim1), x2: (B, in_dim2)
    B, in_dim1, in_dim2 = 8, 16, 16
    hidden_dims1 = [32, 32]
    class_num = 2

    key = jax.random.PRNGKey(0)
    kx1, kx2, kp = jax.random.split(key, 3)
    x1 = jax.random.normal(kx1, (B, in_dim1), jnp.float32)
    x2 = jax.random.normal(kx2, (B, in_dim2), jnp.float32)
    params = init_params(kp, in_dim1, in_dim2, hidden_dims1, class_num)

    # Exactness check with f32 operands.
    out_f32 = jax.block_until_ready(
        dnn_forward(x1, x2, params, compute_dtype=jnp.float32))
    ref_f32 = dnn_forward_ref(x1, x2, params, compute_dtype=jnp.float32)
    assert out_f32.shape == (B, class_num)
    assert jnp.allclose(out_f32, ref_f32, atol=1e-4, rtol=1e-4), "f32 mismatch"

    # Default (performance) path: bf16 operands, f32 accumulation.
    out_bf16 = jax.block_until_ready(dnn_forward(x1, x2, params))
    ref_bf16 = dnn_forward_ref(x1, x2, params, compute_dtype=jnp.bfloat16)
    assert out_bf16.shape == (B, class_num)
    assert jnp.allclose(out_bf16, ref_bf16, atol=2e-2, rtol=2e-2), "bf16 mismatch"

    # Asymmetric input dims (in_dim1 != in_dim2) to exercise the general
    # W1 re-blocking path.
    in_dim1b, in_dim2b = 16, 24
    k1b, k2b, kpb = jax.random.split(jax.random.PRNGKey(1), 3)
    x1b = jax.random.normal(k1b, (B, in_dim1b), jnp.float32)
    x2b = jax.random.normal(k2b, (B, in_dim2b), jnp.float32)
    params_b = init_params(kpb, in_dim1b, in_dim2b, hidden_dims1, class_num)
    out_b = jax.block_until_ready(
        dnn_forward(x1b, x2b, params_b, compute_dtype=jnp.float32))
    ref_b = dnn_forward_ref(x1b, x2b, params_b, compute_dtype=jnp.float32)
    assert out_b.shape == (B, class_num)
    assert jnp.allclose(out_b, ref_b, atol=1e-4, rtol=1e-4), "asym f32 mismatch"

    print("KERNEL_OK")
</pallas_src>

<mosaic_0001>
module attributes {stable_mosaic.version = 11 : i64} {
  func.func @dnn_kernel(%arg0: i32, %arg1: memref<16x32xf32, #tpu.memory_space<vmem>>, %arg2: memref<32x64xf32, #tpu.memory_space<vmem>>, %arg3: memref<1x64xf32, #tpu.memory_space<vmem>>, %arg4: memref<64x64xf32, #tpu.memory_space<vmem>>, %arg5: memref<1x64xf32, #tpu.memory_space<vmem>>, %arg6: memref<64x128xf32, #tpu.memory_space<vmem>>, %arg7: memref<1x128xf32, #tpu.memory_space<vmem>>, %arg8: memref<16x128xf32, #tpu.memory_space<vmem>>) attributes {dimension_semantics = [#tpu.dimension_semantics<parallel>], iteration_bounds = array<i64: 1>, scalar_prefetch = 0 : i64, scratch_operands = 0 : i64, tpu.core_type = #tpu.core_type<tc>, window_params = [{transform_indices = @transform_0, window_bounds = array<i64: 16, 32>}, {pipeline_mode = #tpu.pipeline_mode<synchronous>, transform_indices = @transform_1, window_bounds = array<i64: 32, 64>}, {pipeline_mode = #tpu.pipeline_mode<synchronous>, transform_indices = @transform_2, window_bounds = array<i64: 1, 64>}, {pipeline_mode = #tpu.pipeline_mode<synchronous>, transform_indices = @transform_3, window_bounds = array<i64: 64, 64>}, {pipeline_mode = #tpu.pipeline_mode<synchronous>, transform_indices = @transform_4, window_bounds = array<i64: 1, 64>}, {pipeline_mode = #tpu.pipeline_mode<synchronous>, transform_indices = @transform_5, window_bounds = array<i64: 64, 128>}, {pipeline_mode = #tpu.pipeline_mode<synchronous>, transform_indices = @transform_6, window_bounds = array<i64: 1, 128>}, {transform_indices = @transform_7, window_bounds = array<i64: 16, 128>}]} {
    %c0 = arith.constant 0 : index
    %c0_0 = arith.constant 0 : index
    %0 = vector.load %arg1[%c0, %c0_0] : memref<16x32xf32, #tpu.memory_space<vmem>>, vector<16x32xf32>
    %c0_1 = arith.constant 0 : index
    %c0_2 = arith.constant 0 : index
    %1 = vector.load %arg2[%c0_1, %c0_2] : memref<32x64xf32, #tpu.memory_space<vmem>>, vector<32x64xf32>
    %cst = arith.constant dense<0.000000e+00> : vector<16x64xf32>
    %2 = tpu.matmul %0, %1, %cst {dimension_numbers = #tpu.dot_dimension_numbers<[1], [0], [0], [1], [0, 0, 1, 1], [], []>} : vector<16x32xf32>, vector<32x64xf32>, vector<16x64xf32> -> vector<16x64xf32>
    %c0_3 = arith.constant 0 : index
    %c0_4 = arith.constant 0 : index
    %3 = vector.load %arg3[%c0_3, %c0_4] : memref<1x64xf32, #tpu.memory_space<vmem>>, vector<1x64xf32>
    %4 = vector.broadcast %3 : vector<1x64xf32> to vector<16x64xf32>
    %5 = arith.addf %2, %4 : vector<16x64xf32>
    %cst_5 = arith.constant 0.000000e+00 : f32
    %6 = vector.broadcast %cst_5 : f32 to vector<16x64xf32>
    %7 = arith.maximumf %5, %6 : vector<16x64xf32>
    %c0_6 = arith.constant 0 : index
    %c0_7 = arith.constant 0 : index
    %8 = vector.load %arg4[%c0_6, %c0_7] : memref<64x64xf32, #tpu.memory_space<vmem>>, vector<64x64xf32>
    %cst_8 = arith.constant dense<0.000000e+00> : vector<16x64xf32>
    %9 = tpu.matmul %7, %8, %cst_8 {dimension_numbers = #tpu.dot_dimension_numbers<[1], [0], [0], [1], [0, 0, 1, 1], [], []>} : vector<16x64xf32>, vector<64x64xf32>, vector<16x64xf32> -> vector<16x64xf32>
    %c0_9 = arith.constant 0 : index
    %c0_10 = arith.constant 0 : index
    %10 = vector.load %arg5[%c0_9, %c0_10] : memref<1x64xf32, #tpu.memory_space<vmem>>, vector<1x64xf32>
    %11 = vector.broadcast %10 : vector<1x64xf32> to vector<16x64xf32>
    %12 = arith.addf %9, %11 : vector<16x64xf32>
    %cst_11 = arith.constant 0.000000e+00 : f32
    %13 = vector.broadcast %cst_11 : f32 to vector<16x64xf32>
    %14 = arith.maximumf %12, %13 : vector<16x64xf32>
    %c0_12 = arith.constant 0 : index
    %c0_13 = arith.constant 0 : index
    %15 = vector.load %arg6[%c0_12, %c0_13] : memref<64x128xf32, #tpu.memory_space<vmem>>, vector<64x128xf32>
    %cst_14 = arith.constant dense<0.000000e+00> : vector<16x128xf32>
    %16 = tpu.matmul %14, %15, %cst_14 {dimension_numbers = #tpu.dot_dimension_numbers<[1], [0], [0], [1], [0, 0, 1, 1], [], []>} : vector<16x64xf32>, vector<64x128xf32>, vector<16x128xf32> -> vector<16x128xf32>
    %c0_15 = arith.constant 0 : index
    %c0_16 = arith.constant 0 : index
    %17 = vector.load %arg7[%c0_15, %c0_16] : memref<1x128xf32, #tpu.memory_space<vmem>>, vector<1x128xf32>
    %18 = vector.broadcast %17 : vector<1x128xf32> to vector<16x128xf32>
    %19 = arith.addf %16, %18 : vector<16x128xf32>
    %c0_17 = arith.constant 0 : index
    %c0_18 = arith.constant 0 : index
    %20 = vector.load %arg8[%c0_17, %c0_18] : memref<16x128xf32, #tpu.memory_space<vmem>>, vector<16x128xf32>
    tpu.vector_store %arg8[%c0_17, %c0_18], %19 {strides = array<i32>} : memref<16x128xf32, #tpu.memory_space<vmem>>, vector<16x128xf32>,
    return
  }
  func.func @transform_0(%arg0: i32) -> (i32, i32) {
    %c0_i32 = arith.constant 0 : i32
    %c0_i32_0 = arith.constant 0 : i32
    return %arg0, %c0_i32 : i32, i32
  }
  func.func @transform_1(%arg0: i32) -> (i32, i32) {
    %c0_i32 = arith.constant 0 : i32
    %c0_i32_0 = arith.constant 0 : i32
    %c0_i32_1 = arith.constant 0 : i32
    return %c0_i32, %c0_i32_0 : i32, i32
  }
  func.func @transform_2(%arg0: i32) -> (i32, i32) {
    %c0_i32 = arith.constant 0 : i32
    %c0_i32_0 = arith.constant 0 : i32
    %c0_i32_1 = arith.constant 0 : i32
    return %c0_i32, %c0_i32_0 : i32, i32
  }
  func.func @transform_3(%arg0: i32) -> (i32, i32) {
    %c0_i32 = arith.constant 0 : i32
    %c0_i32_0 = arith.constant 0 : i32
    %c0_i32_1 = arith.constant 0 : i32
    return %c0_i32, %c0_i32_0 : i32, i32
  }
  func.func @transform_4(%arg0: i32) -> (i32, i32) {
    %c0_i32 = arith.constant 0 : i32
    %c0_i32_0 = arith.constant 0 : i32
    %c0_i32_1 = arith.constant 0 : i32
    return %c0_i32, %c0_i32_0 : i32, i32
  }
  func.func @transform_5(%arg0: i32) -> (i32, i32) {
    %c0_i32 = arith.constant 0 : i32
    %c0_i32_0 = arith.constant 0 : i32
    %c0_i32_1 = arith.constant 0 : i32
    return %c0_i32, %c0_i32_0 : i32, i32
  }
  func.func @transform_6(%arg0: i32) -> (i32, i32) {
    %c0_i32 = arith.constant 0 : i32
    %c0_i32_0 = arith.constant 0 : i32
    %c0_i32_1 = arith.constant 0 : i32
    return %c0_i32, %c0_i32_0 : i32, i32
  }
  func.func @transform_7(%arg0: i32) -> (i32, i32) {
    %c0_i32 = arith.constant 0 : i32
    %c0_i32_0 = arith.constant 0 : i32
    return %arg0, %c0_i32 : i32, i32
  }
}

</mosaic_0001>

<bundles_post_ra>
// kernel: dnn_forward.1
= control target key start
LH: loop header
LB: loop body
LE: loop exit
PB: predicated region body
PF: predicated region fallthrough
CT: control target
= control target key end

     0   :  { %vm39_vm0 = vcmask 261120   ;;  %vm138_vm1 = vcmask 523264   ;;  %s575_s1 = inlined_call_operand.vmem [shape: f32[32,64], index: 1, kind: input, shape index: {}]   ;;  %s576_s0 = inlined_call_operand.vmem [shape: f32[16,32], index: 0, kind: input, shape index: {}]   ;;  %s577_s3 = inlined_call_operand.vmem [shape: f32[64,64], index: 3, kind: input, shape index: {}]   ;;  %s578_s5 = inlined_call_operand.vmem [shape: f32[64,128], index: 5, kind: input, shape index: {}]   ;;  %s579_s2 = inlined_call_operand.vmem [shape: f32[1,64], index: 2, kind: input, shape index: {}]   ;;  %s580_s4 = inlined_call_operand.vmem [shape: f32[1,64], index: 4, kind: input, shape index: {}]   ;;  %s581_s6 = inlined_call_operand.vmem [shape: f32[1,128], index: 6, kind: input, shape index: {}]   ;;  %s582_s7 = inlined_call_operand.vmem [shape: f32[16,128], index: 7, kind: output, shape index: {}]  }
   0x1   :  { %v28_v0 = vld [vmem:[%s575_s1] sm:$0xff]  ;;  %v29_v1 = vld [vmem:[%s575_s1 + $0x8] sm:$0xff]  ;;  %v30_v2 = vld [vmem:[%s575_s1 + $0x10] sm:$0xff] }
   0x2   :  { %v408_v3 = vpack.c.bf16 %v29_v1, %v28_v0  ;;  %v31_v4 = vld [vmem:[%s575_s1 + $0x18] sm:$0xff]  ;;  %v26_v5 = vld [vmem:[%s576_s0] sm:$0xff]  ;;  %v124_v8 = vld [vmem:[%s577_s3 + $0x8] sm:$0xff] }
   0x3   :  { %v412_v6 = vpack.c.bf16 %v31_v4, %v30_v2  ;;  %367 = vmatprep.mubr.msk.f32.mxu0 %vm39_vm0, %v26_v5  ;;  %v123_v7 = vld [vmem:[%s577_s3] sm:$0xff]  ;;  %v125_v9 = vld [vmem:[%s577_s3 + $0x10] sm:$0xff]  ;;  %v126_v11 = vld [vmem:[%s577_s3 + $0x18] sm:$0xff] }
   0x4   :  { %409 = vmatprep.subr.bf16.mxu0 %v408_v3  ;;  %v416_v10 = vpack.c.bf16 %v124_v8, %v123_v7  ;;  %v420_v12 = vpack.c.bf16 %v126_v11, %v125_v9  ;;  %v127_v13 = vld [vmem:[%s577_s3 + $0x20] sm:$0xff]  ;;  %v128_v14 = vld [vmem:[%s577_s3 + $0x28] sm:$0xff]  ;;  %v129_v17 = vld [vmem:[%s577_s3 + $0x30] sm:$0xff] }
   0x5   :  { %411 = vmatpush3.bf16.msra.mxu0 %v408_v3  ;;  %v424_v15 = vpack.c.bf16 %v128_v14, %v127_v13  ;;  %v27_v16 = vld [vmem:[%s576_s0 + $0x8] sm:$0xff]  ;;  %v130_v18 = vld [vmem:[%s577_s3 + $0x38] sm:$0xff]  ;;  %v222_v20 = vld [vmem:[%s578_s5] sm:$0xff] }
   0x6   :  { %413 = vmatprep.subr.bf16.mxu0 %v412_v6  ;;  %417 = vmatprep.subr.bf16.mxu1 %v416_v10  ;;  %v428_v19 = vpack.c.bf16 %v130_v18, %v129_v17  ;;  %v223_v21 = vld [vmem:[%s578_s5 + $0x8] sm:$0xff]  ;;  %v224_v22 = vld [vmem:[%s578_s5 + $0x10] sm:$0xff]  ;;  %v225_v24 = vld [vmem:[%s578_s5 + $0x18] sm:$0xff] }
   0x7   :  { %419 = vmatpush3.bf16.msra.mxu1 %v416_v10  ;;  %v432_v23 = vpack.c.bf16 %v223_v21, %v222_v20  ;;  %v436_v25 = vpack.c.bf16 %v225_v24, %v224_v22  ;;  %v226_v26 = vld [vmem:[%s578_s5 + $0x20] sm:$0xff]  ;;  %v227_v27 = vld [vmem:[%s578_s5 + $0x28] sm:$0xff]  ;;  %v228_v36 = vld [vmem:[%s578_s5 + $0x30] sm:$0xff] }
   0x8   :  { %421 = vmatprep.subr.bf16.mxu1 %v420_v12  ;;  %v440_v28 = vpack.c.bf16 %v227_v27, %v226_v26  ;;  %v324_v29 = vld [vmem:[%s579_s2] ss:$0 sm:$0xff]  ;;  %v229_v37 = vld [vmem:[%s578_s5 + $0x38] sm:$0xff] }
   0x9   :  { %415 = vmatpush3.bf16.msra.mxu0 %v412_v6  ;;  %v444_v38 = vpack.c.bf16 %v229_v37, %v228_v36  ;;  %v327_v39 = vld [vmem:[%s580_s4] ss:$0 sm:$0xff] }
   0xa   :  { %433 = vmatprep.subr.bf16.mxu0 %v432_v23  ;;  %v330_v46 = vld [vmem:[%s581_s6] ss:$0 sm:$0xff] }
   0xb   :  { %423 = vmatpush3.bf16.msra.mxu1 %v420_v12 }
   0xc   :  { %368 = vmatmul.mubr.msk.f32.vlgmr.msra.gmra.mrb[0].mxu0 %vm39_vm0, %v27_v16  ;;  %425 = vmatprep.subr.bf16.mxu1 %v424_v15 }
   0xd   :  { %435 = vmatpush3.bf16.msra.mxu0 %v432_v23 }
   0xe   :  { %437 = vmatprep.subr.bf16.mxu0 %v436_v25 }
   0xf   :  { %427 = vmatpush3.bf16.msra.mxu1 %v424_v15 }
  0x10   :  { %429 = vmatprep.subr.bf16.mxu1 %v428_v19 }
  0x11   :  { %439 = vmatpush3.bf16.msra.mxu0 %v436_v25 }
  0x12   :  { %441 = vmatprep.subr.bf16.mxu0 %v440_v28 }
  0x13   :  { %431 = vmatpush3.bf16.msra.mxu1 %v428_v19 }
  0x15   :  { %443 = vmatpush3.bf16.msra.mxu0 %v440_v28 }
  0x16   :  { %445 = vmatprep.subr.bf16.mxu0 %v444_v38 }
  0x19   :  { %447 = vmatpush3.bf16.msra.mxu0 %v444_v38 }
  0xdf   :  { %v369_v30 = vpop.f32.mrb[0].mxu0 }
  0xe0   :  { %v118_v31 = vadd.f32 %v369_v30, %v324_v29  ;;  %v112_v32 = vpop.f32.mrb[1].mxu0 }
  0xe1   :  { %v113_v33 = vadd.f32 %v324_v29, %v112_v32 }
  0xe2   :  { %v122_v35 = vmax.f32 %v118_v31, 0.0 }
  0xe3   :  { %v121_v34 = vmax.f32 %v113_v33, 0.0 }
  0xe5   :  { %386 = vmatprep.mubr.msk.f32.mxu1 %vm138_vm1, %v121_v34 }
  0xe6   :  { %387 = vmatmul.mubr.msk.f32.vlgmr.msra.gmra.mrb[0].mxu1 %vm138_vm1, %v122_v35 }
 0x1b9   :  { %v388_v40 = vpop.f32.mrb[0].mxu1 }
 0x1ba   :  { %v217_v41 = vadd.f32 %v388_v40, %v327_v39  ;;  %v211_v42 = vpop.f32.mrb[1].mxu1 }
 0x1bb   :  { %v212_v43 = vadd.f32 %v327_v39, %v211_v42 }
 0x1bc   :  { %v221_v45 = vmax.f32 %v217_v41, 0.0 }
 0x1bd   :  { %v220_v44 = vmax.f32 %v212_v43, 0.0 }
 0x1bf   :  { %405 = vmatprep.mubr.msk.f32.mxu0 %vm138_vm1, %v220_v44 }
 0x1c0   :  { %406 = vmatmul.mubr.msk.f32.vlgmr.msra.gmra.mrb[2].mxu0 %vm138_vm1, %v221_v45 }
 0x293   :  { %v407_v47 = vpop.f32.mrb[2].mxu0 }
 0x294   :  { %v315_v48 = vadd.f32 %v407_v47, %v330_v46  ;;  %v309_v49 = vpop.f32.mrb[3].mxu0 }
 0x295   :  { %v310_v50 = vadd.f32 %v330_v46, %v309_v49 }
 0x296   :  { %319 = vst [vmem:[%s582_s7 + $0x8] sm:$0xff] %v315_v48 }
 0x297   :  { %318 = vst [vmem:[%s582_s7] sm:$0xff] %v310_v50 }

</bundles_post_ra>
